<compile_context>
chip_gen: v6e
topology: v6e:2x2x1
jax: 0.10.0
libtpu: 0.0.40
codegen_flags: <defaults>
</compile_context>

<pallas_src>
import functools

import jax
import jax.numpy as jnp
from jax.experimental import pallas as pl
from jax.experimental.pallas import tpu as pltpu

IN_DIM = 4
HID_DIM = 64
OUT_DIM = 2


def _pinn_kernel(x_ref, w1_ref, b1_ref, w2_ref, b2_ref, w3_ref, b3_ref, o_ref,
                 *, use_bf16):
    """Fused 3-layer MLP on a (features, batch) tile.

    x_ref : (4,  tm)   batch on lanes
    w1    : (64, 4)    b1: (64, 1)
    w2    : (64, 64)   b2: (64, 1)
    w3    : (2,  64)   b3: (2,  1)
    o_ref : (2,  tm)
    """
    x = x_ref[...]                                   # (4, tm), f32
    w1 = w1_ref[...]                                 # (64, 4), f32

    # ---- Layer 1: K=4 contraction as 4 VPU broadcast FMAs (MXU stays free) ----
    h1 = w1[:, 0:1] * x[0:1, :]                      # (64, tm)
    for k in range(1, IN_DIM):
        h1 = h1 + w1[:, k:k + 1] * x[k:k + 1, :]
    h1 = jnp.maximum(h1 + b1_ref[...], 0.0)          # bias + ReLU in f32

    dot_dtype = jnp.bfloat16 if use_bf16 else jnp.float32

    # ---- Layer 2: 64x64 MXU matmul, f32 accumulation ----
    h2 = jnp.dot(w2_ref[...].astype(dot_dtype), h1.astype(dot_dtype),
                 preferred_element_type=jnp.float32)  # (64, tm)
    h2 = jnp.maximum(h2 + b2_ref[...], 0.0)

    # ---- Layer 3: (2, 64) @ (64, tm) ----
    y = jnp.dot(w3_ref[...].astype(dot_dtype), h2.astype(dot_dtype),
                preferred_element_type=jnp.float32)   # (2, tm)
    o_ref[...] = (y + b3_ref[...]).astype(o_ref.dtype)


@functools.partial(jax.jit, static_argnames=("tm", "use_bf16"))
def pinn_forward(x, params, *, tm=512, use_bf16=False):
    """x: (N, 4) float32. params: torch-layout weights (out,in) and (out,1) biases."""
    assert tm % 128 == 0, "tile must be lane-aligned (multiple of 128)"
    n = x.shape[0]

    # Guardrail (v7x): keep >= 2 grid steps when possible so both TCs get work.
    tm_eff = tm
    while tm_eff > 128 and pl.cdiv(n, tm_eff) < 2:
        tm_eff //= 2

    n_pad = pl.cdiv(n, tm_eff) * tm_eff

    # Features-on-sublanes / batch-on-lanes layout; pad batch to a tile multiple.
    x_t = jnp.transpose(x)                            # (4, N)
    if n_pad != n:
        x_t = jnp.pad(x_t, ((0, 0), (0, n_pad - n)))  # (4, n_pad)

    w1, b1 = params["w1"], params["b1"]               # (64, 4), (64, 1)
    w2, b2 = params["w2"], params["b2"]               # (64, 64), (64, 1)
    w3, b3 = params["w3"], params["b3"]               # (2, 64),  (2, 1)

    # Constant index_map => block index never changes => weights stay resident
    # in VMEM across the batch grid (no per-step re-DMA).
    full = lambda shape: pl.BlockSpec(shape, lambda i: (0, 0))

    flops = 2 * n_pad * (IN_DIM * HID_DIM + HID_DIM * HID_DIM + HID_DIM * OUT_DIM)
    bytes_accessed = 4 * (
        n_pad * (IN_DIM + OUT_DIM)
        + IN_DIM * HID_DIM + HID_DIM
        + HID_DIM * HID_DIM + HID_DIM
        + HID_DIM * OUT_DIM + OUT_DIM
    )
    cost = pl.CostEstimate(flops=flops, transcendentals=0,
                           bytes_accessed=bytes_accessed)

    out_t = pl.pallas_call(
        functools.partial(_pinn_kernel, use_bf16=use_bf16),
        out_shape=jax.ShapeDtypeStruct((OUT_DIM, n_pad), x.dtype),
        grid_spec=pl.GridSpec(
            grid=(n_pad // tm_eff,),
            in_specs=[
                pl.BlockSpec((IN_DIM, tm_eff), lambda i: (0, i)),   # x tile (4, tm)
                full((HID_DIM, IN_DIM)),                            # W1
                full((HID_DIM, 1)),                                 # b1
                full((HID_DIM, HID_DIM)),                           # W2
                full((HID_DIM, 1)),                                 # b2
                full((OUT_DIM, HID_DIM)),                           # W3
                full((OUT_DIM, 1)),                                 # b3
            ],
            out_specs=pl.BlockSpec((OUT_DIM, tm_eff), lambda i: (0, i)),
        ),
        compiler_params=pltpu.CompilerParams(
            dimension_semantics=("parallel",),
        ),
        cost_estimate=cost,
    )(x_t, w1, b1, w2, b2, w3, b3)

    return jnp.transpose(out_t[:, :n])                # (N, 2)


def init_params(key):
    """Torch-layout init mimicking nn.Linear default: U(-1/sqrt(fan_in), 1/sqrt(fan_in))."""
    ks = jax.random.split(key, 6)

    def lin(kw, kb, fan_in, fan_out):
        bound = 1.0 / jnp.sqrt(jnp.float32(fan_in))
        w = jax.random.uniform(kw, (fan_out, fan_in), jnp.float32, -bound, bound)
        b = jax.random.uniform(kb, (fan_out, 1), jnp.float32, -bound, bound)
        return w, b

    w1, b1 = lin(ks[0], ks[1], IN_DIM, HID_DIM)
    w2, b2 = lin(ks[2], ks[3], HID_DIM, HID_DIM)
    w3, b3 = lin(ks[4], ks[5], HID_DIM, OUT_DIM)
    return {"w1": w1, "b1": b1, "w2": w2, "b2": b2, "w3": w3, "b3": b3}


def pinn_forward_ref(x, params):
    h = jnp.maximum(x @ params["w1"].T + params["b1"][:, 0], 0.0)
    h = jnp.maximum(h @ params["w2"].T + params["b2"][:, 0], 0.0)
    return h @ params["w3"].T + params["b3"][:, 0]


if __name__ == "__main__":
    key = jax.random.PRNGKey(0)
    kp, kx = jax.random.split(key)
    params = init_params(kp)

    # Batch of PINN collocation points; deliberately NOT a multiple of the tile
    # to exercise the padding path.  tm=512 -> grid of 2 steps.
    n = 1000
    x = jax.random.normal(kx, (n, IN_DIM), jnp.float32)

    ref = pinn_forward_ref(x, params)

    out = pinn_forward(x, params, tm=512)
    jax.block_until_ready(out)
    assert out.shape == (n, OUT_DIM)
    assert jnp.allclose(out, ref, atol=2e-5, rtol=2e-5)

    # bf16-MXU variant (v6e/v7x): matmul operands bf16, f32 accumulation and
    # f32 elementwise math (also safe on v5e).
    out_bf16 = pinn_forward(x, params, tm=512, use_bf16=True)
    jax.block_until_ready(out_bf16)
    assert jnp.allclose(out_bf16, ref, atol=1e-1, rtol=1e-1)

    print("KERNEL_OK")
</pallas_src>

<mosaic_0001>
module attributes {stable_mosaic.version = 11 : i64} {
  func.func @_pinn_kernel(%arg0: i32, %arg1: memref<4x512xf32, #tpu.memory_space<vmem>>, %arg2: memref<64x4xf32, #tpu.memory_space<vmem>>, %arg3: memref<64x1xf32, #tpu.memory_space<vmem>>, %arg4: memref<64x64xf32, #tpu.memory_space<vmem>>, %arg5: memref<64x1xf32, #tpu.memory_space<vmem>>, %arg6: memref<2x64xf32, #tpu.memory_space<vmem>>, %arg7: memref<2x1xf32, #tpu.memory_space<vmem>>, %arg8: memref<2x512xf32, #tpu.memory_space<vmem>>) attributes {dimension_semantics = [#tpu.dimension_semantics<parallel>], iteration_bounds = array<i64: 2>, scalar_prefetch = 0 : i64, scratch_operands = 0 : i64, tpu.core_type = #tpu.core_type<tc>, window_params = [{transform_indices = @transform_0, window_bounds = array<i64: 4, 512>}, {pipeline_mode = #tpu.pipeline_mode<synchronous>, transform_indices = @transform_1, window_bounds = array<i64: 64, 4>}, {pipeline_mode = #tpu.pipeline_mode<synchronous>, transform_indices = @transform_2, window_bounds = array<i64: 64, 1>}, {pipeline_mode = #tpu.pipeline_mode<synchronous>, transform_indices = @transform_3, window_bounds = array<i64: 64, 64>}, {pipeline_mode = #tpu.pipeline_mode<synchronous>, transform_indices = @transform_4, window_bounds = array<i64: 64, 1>}, {pipeline_mode = #tpu.pipeline_mode<synchronous>, transform_indices = @transform_5, window_bounds = array<i64: 2, 64>}, {pipeline_mode = #tpu.pipeline_mode<synchronous>, transform_indices = @transform_6, window_bounds = array<i64: 2, 1>}, {transform_indices = @transform_7, window_bounds = array<i64: 2, 512>}]} {
    %c0 = arith.constant 0 : index
    %c0_0 = arith.constant 0 : index
    %0 = vector.load %arg1[%c0, %c0_0] : memref<4x512xf32, #tpu.memory_space<vmem>>, vector<4x512xf32>
    %c0_1 = arith.constant 0 : index
    %c0_2 = arith.constant 0 : index
    %1 = vector.load %arg2[%c0_1, %c0_2] : memref<64x4xf32, #tpu.memory_space<vmem>>, vector<64x4xf32>
    %2 = vector.extract_strided_slice %1 {offsets = [0, 0], sizes = [64, 1], strides = [1, 1]} : vector<64x4xf32> to vector<64x1xf32>
    %3 = vector.extract_strided_slice %0 {offsets = [0, 0], sizes = [1, 512], strides = [1, 1]} : vector<4x512xf32> to vector<1x512xf32>
    %4 = vector.broadcast %2 : vector<64x1xf32> to vector<64x512xf32>
    %5 = vector.broadcast %3 : vector<1x512xf32> to vector<64x512xf32>
    %6 = arith.mulf %4, %5 : vector<64x512xf32>
    %7 = vector.extract_strided_slice %1 {offsets = [0, 1], sizes = [64, 1], strides = [1, 1]} : vector<64x4xf32> to vector<64x1xf32>
    %8 = vector.extract_strided_slice %0 {offsets = [1, 0], sizes = [1, 512], strides = [1, 1]} : vector<4x512xf32> to vector<1x512xf32>
    %9 = vector.broadcast %7 : vector<64x1xf32> to vector<64x512xf32>
    %10 = vector.broadcast %8 : vector<1x512xf32> to vector<64x512xf32>
    %11 = arith.mulf %9, %10 : vector<64x512xf32>
    %12 = arith.addf %6, %11 : vector<64x512xf32>
    %13 = vector.extract_strided_slice %1 {offsets = [0, 2], sizes = [64, 1], strides = [1, 1]} : vector<64x4xf32> to vector<64x1xf32>
    %14 = vector.extract_strided_slice %0 {offsets = [2, 0], sizes = [1, 512], strides = [1, 1]} : vector<4x512xf32> to vector<1x512xf32>
    %15 = vector.broadcast %13 : vector<64x1xf32> to vector<64x512xf32>
    %16 = vector.broadcast %14 : vector<1x512xf32> to vector<64x512xf32>
    %17 = arith.mulf %15, %16 : vector<64x512xf32>
    %18 = arith.addf %12, %17 : vector<64x512xf32>
    %19 = vector.extract_strided_slice %1 {offsets = [0, 3], sizes = [64, 1], strides = [1, 1]} : vector<64x4xf32> to vector<64x1xf32>
    %20 = vector.extract_strided_slice %0 {offsets = [3, 0], sizes = [1, 512], strides = [1, 1]} : vector<4x512xf32> to vector<1x512xf32>
    %21 = vector.broadcast %19 : vector<64x1xf32> to vector<64x512xf32>
    %22 = vector.broadcast %20 : vector<1x512xf32> to vector<64x512xf32>
    %23 = arith.mulf %21, %22 : vector<64x512xf32>
    %24 = arith.addf %18, %23 : vector<64x512xf32>
    %c0_3 = arith.constant 0 : index
    %c0_4 = arith.constant 0 : index
    %25 = vector.load %arg3[%c0_3, %c0_4] : memref<64x1xf32, #tpu.memory_space<vmem>>, vector<64x1xf32>
    %26 = vector.broadcast %25 : vector<64x1xf32> to vector<64x512xf32>
    %27 = arith.addf %24, %26 : vector<64x512xf32>
    %cst = arith.constant 0.000000e+00 : f32
    %28 = vector.broadcast %cst : f32 to vector<64x512xf32>
    %29 = arith.maximumf %27, %28 : vector<64x512xf32>
    %c0_5 = arith.constant 0 : index
    %c0_6 = arith.constant 0 : index
    %30 = vector.load %arg4[%c0_5, %c0_6] : memref<64x64xf32, #tpu.memory_space<vmem>>, vector<64x64xf32>
    %cst_7 = arith.constant dense<0.000000e+00> : vector<64x512xf32>
    %31 = tpu.matmul %30, %29, %cst_7 {dimension_numbers = #tpu.dot_dimension_numbers<[1], [0], [0], [1], [0, 0, 1, 1], [], []>} : vector<64x64xf32>, vector<64x512xf32>, vector<64x512xf32> -> vector<64x512xf32>
    %c0_8 = arith.constant 0 : index
    %c0_9 = arith.constant 0 : index
    %32 = vector.load %arg5[%c0_8, %c0_9] : memref<64x1xf32, #tpu.memory_space<vmem>>, vector<64x1xf32>
    %33 = vector.broadcast %32 : vector<64x1xf32> to vector<64x512xf32>
    %34 = arith.addf %31, %33 : vector<64x512xf32>
    %cst_10 = arith.constant 0.000000e+00 : f32
    %35 = vector.broadcast %cst_10 : f32 to vector<64x512xf32>
    %36 = arith.maximumf %34, %35 : vector<64x512xf32>
    %c0_11 = arith.constant 0 : index
    %c0_12 = arith.constant 0 : index
    %37 = vector.load %arg6[%c0_11, %c0_12] : memref<2x64xf32, #tpu.memory_space<vmem>>, vector<2x64xf32>
    %cst_13 = arith.constant dense<0.000000e+00> : vector<2x512xf32>
    %38 = tpu.matmul %37, %36, %cst_13 {dimension_numbers = #tpu.dot_dimension_numbers<[1], [0], [0], [1], [0, 0, 1, 1], [], []>} : vector<2x64xf32>, vector<64x512xf32>, vector<2x512xf32> -> vector<2x512xf32>
    %c0_14 = arith.constant 0 : index
    %c0_15 = arith.constant 0 : index
    %39 = vector.load %arg7[%c0_14, %c0_15] : memref<2x1xf32, #tpu.memory_space<vmem>>, vector<2x1xf32>
    %40 = vector.broadcast %39 : vector<2x1xf32> to vector<2x512xf32>
    %41 = arith.addf %38, %40 : vector<2x512xf32>
    %c0_16 = arith.constant 0 : index
    %c0_17 = arith.constant 0 : index
    %42 = vector.load %arg8[%c0_16, %c0_17] : memref<2x512xf32, #tpu.memory_space<vmem>>, vector<2x512xf32>
    tpu.vector_store %arg8[%c0_16, %c0_17], %41 {strides = array<i32>} : memref<2x512xf32, #tpu.memory_space<vmem>>, vector<2x512xf32>,
    return
  }
  func.func @transform_0(%arg0: i32) -> (i32, i32) {
    %c0_i32 = arith.constant 0 : i32
    %c0_i32_0 = arith.constant 0 : i32
    return %c0_i32, %arg0 : i32, i32
  }
  func.func @transform_1(%arg0: i32) -> (i32, i32) {
    %c0_i32 = arith.constant 0 : i32
    %c0_i32_0 = arith.constant 0 : i32
    %c0_i32_1 = arith.constant 0 : i32
    return %c0_i32, %c0_i32_0 : i32, i32
  }
  func.func @transform_2(%arg0: i32) -> (i32, i32) {
    %c0_i32 = arith.constant 0 : i32
    %c0_i32_0 = arith.constant 0 : i32
    %c0_i32_1 = arith.constant 0 : i32
    return %c0_i32, %c0_i32_0 : i32, i32
  }
  func.func @transform_3(%arg0: i32) -> (i32, i32) {
    %c0_i32 = arith.constant 0 : i32
    %c0_i32_0 = arith.constant 0 : i32
    %c0_i32_1 = arith.constant 0 : i32
    return %c0_i32, %c0_i32_0 : i32, i32
  }
  func.func @transform_4(%arg0: i32) -> (i32, i32) {
    %c0_i32 = arith.constant 0 : i32
    %c0_i32_0 = arith.constant 0 : i32
    %c0_i32_1 = arith.constant 0 : i32
    return %c0_i32, %c0_i32_0 : i32, i32
  }
  func.func @transform_5(%arg0: i32) -> (i32, i32) {
    %c0_i32 = arith.constant 0 : i32
    %c0_i32_0 = arith.constant 0 : i32
    %c0_i32_1 = arith.constant 0 : i32
    return %c0_i32, %c0_i32_0 : i32, i32
  }
  func.func @transform_6(%arg0: i32) -> (i32, i32) {
    %c0_i32 = arith.constant 0 : i32
    %c0_i32_0 = arith.constant 0 : i32
    %c0_i32_1 = arith.constant 0 : i32
    return %c0_i32, %c0_i32_0 : i32, i32
  }
  func.func @transform_7(%arg0: i32) -> (i32, i32) {
    %c0_i32 = arith.constant 0 : i32
    %c0_i32_0 = arith.constant 0 : i32
    return %c0_i32, %arg0 : i32, i32
  }
}

</mosaic_0001>

<bundles_post_ra>
// kernel: pinn_forward.1
= control target key start
LH: loop header
LB: loop body
LE: loop exit
PB: predicated region body
PF: predicated region fallthrough
CT: control target
= control target key end

     0   :  { %s1604_s24 = smov 0   ;;  %s2167_s0 = inlined_call_operand.vmem [shape: f32[4,1024], index: 0, kind: input, shape index: {}]   ;;  %s2168_s1 = inlined_call_operand.vmem [shape: f32[64,4], index: 1, kind: input, shape index: {}]   ;;  %s2169_s2 = inlined_call_operand.vmem [shape: f32[64,1], index: 2, kind: input, shape index: {}]   ;;  %s2170_s3 = inlined_call_operand.vmem [shape: f32[64,64], index: 3, kind: input, shape index: {}]   ;;  %s2171_s4 = inlined_call_operand.vmem [shape: f32[64,1], index: 4, kind: input, shape index: {}]   ;;  %s2172_s5 = inlined_call_operand.vmem [shape: f32[2,64], index: 5, kind: input, shape index: {}]   ;;  %s2173_s6 = inlined_call_operand.vmem [shape: f32[2,1], index: 6, kind: input, shape index: {}]   ;;  %s2174_s7 = inlined_call_operand.vmem [shape: f32[2,1024], index: 7, kind: output, shape index: {}]  }
   0x1 LB: > { %s1480_s25 = sadd.s32 4294967295, %s1556_s24   ;;  %p1484_p0 = scmp.ge.s32.totalorder %s1556_s24, 1  ;;  %s1556_s24 = sphi %s1604_s24, %s17_s24  }
   0x2   : > { %p238_p1 = scmp.lt.s32.totalorder %s1556_s24, 3 }
   0x4   : > { %p239_p2 = pnand %p1484_p0, %p238_p1 }
   0x6   : > { %242 = sbr.rel (%p239_p2) target bundleno = 710 (0x2c6), region = 48 }
   0xb   : > { %v290_v0 = vld [vmem:[%s2168_s1 + $0x30] sm:$0xff]  ;;  %v289_v1 = vld [vmem:[%s2168_s1 + $0x28] sm:$0xff]  ;;  %v1558_v2 = vmov 2   ;;  %v1559_v3 = vmov 0   ;;  %v287_v4 = vld [vmem:[%s2168_s1 + $0x18] sm:$0xff]  ;;  %v1560_v5 = vmov 1   ;;  %v334_v34 = vlaneseq }
   0xc   : > { %1530 = vset.pattern.permute.xlu0 %v1558_v2  ;;  %1523 = vset.pattern.permute.xlu1 %v1559_v3  ;;  %v291_v6 = vld [vmem:[%s2168_s1 + $0x38] sm:$0xff]  ;;  %v1561_v7 = vmov 3   ;;  %v288_v8 = vld [vmem:[%s2168_s1 + $0x20] sm:$0xff]  ;;  %v285_v11 = vld [vmem:[%s2168_s1 + $0x8] sm:$0xff]  ;;  %v2175_v25 = vmov 0.0   ;;  %s1485_s28 = sshll.u32 %s1480_s25, 2 }
   0xd   : > { %324 = vperm.xlu1 %1523, %v290_v0   ;;  %555 = vperm.xlu0 %1530, %v289_v1   ;;  %v284_v9 = vld [vmem:[%s2168_s1] sm:$0xff]  ;;  %v805_v10 = vld [vmem:[%s2169_s2 + $0x38] sm:$0xff]  ;;  %v286_v14 = vld [vmem:[%s2168_s1 + $0x10] sm:$0xff]  ;;  %p271_p3 = scmp.lt.s32.totalorder %s1485_s28, 7  ;;  %v1735_v38 = vshrl.u32 %v334_v34, 7  ;;  %vm966_vm0 = vcmask 523264  }
   0xe   : > { %v802_v12 = vld [vmem:[%s2169_s2 + $0x20] sm:$0xff]  ;;  %v801_v13 = vld [vmem:[%s2169_s2 + $0x18] sm:$0xff]  ;;  %v800_v15 = vld [vmem:[%s2169_s2 + $0x10] sm:$0xff]  ;;  %1055 = vmatprep.mubr.f32.mxu0 %v2175_v25  ;;  %1168 = vmatprep.mubr.f32.mxu1 %v2175_v25 }
   0xf   : > { %v798_v16 = vld [vmem:[%s2169_s2] sm:$0xff]  ;;  %v924_v17 = vld [vmem:[%s2171_s4 + $0x30] sm:$0xff]  ;;  %v803_v22 = vld [vmem:[%s2169_s2 + $0x28] sm:$0xff]  ;;  %s2192_s28 = smov (!%p271_p3, %s1485_s28), 7  ;;  %2182 = vst [vmem:[#allocation2_spill] sm:$0xff] %v1735_v38  ;;  %v336_v40 = vsub.s32 0, %v1735_v38 }
  0x10   : > { %v922_v18 = vld [vmem:[%s2171_s4 + $0x20] sm:$0xff]  ;;  %v804_v19 = vld [vmem:[%s2169_s2 + $0x30] sm:$0xff]  ;;  %v799_v23 = vld [vmem:[%s2169_s2 + $0x8] sm:$0xff]  ;;  %s1486_s11 = sshll.u32 %s2192_s28, 2  ;;  %v340_v41 = vsub.s32 4, %v1735_v38  ;;  %v436_v45 = vsub.s32 1, %v1735_v38 }
  0x11   : > { %1524 = vset.pattern.permute.xlu1 %v1560_v5  ;;  %547 = vperm.xlu0 %1530, %v287_v4   ;;  %v920_v20 = vld [vmem:[%s2171_s4 + $0x10] sm:$0xff]  ;;  %v918_v21 = vld [vmem:[%s2171_s4] sm:$0xff]  ;;  %v925_v24 = vld [vmem:[%s2171_s4 + $0x38] sm:$0xff]  ;;  %s274_s14 = scalar_lea.vmem %s2167_s0, %s1486_s11  ;;  %v440_v46 = vsub.s32 5, %v1735_v38  ;;  %v568_v48 = vsub.s32 2, %v1735_v38  ;;  %v572_v49 = vsub.s32 6, %v1735_v38 }
  0x12   : > { %427 = vperm.xlu1 %1524, %v290_v0   ;;  %v923_v28 = vld [vmem:[%s2171_s4 + $0x28] sm:$0xff]  ;;  %v921_v30 = vld [vmem:[%s2171_s4 + $0x18] sm:$0xff]  ;;  %v1250_v36 = vld [vmem:[%s2173_s6] sm:$0x3]  ;;  %v700_v55 = vsub.s32 3, %v1735_v38  ;;  %v704_v56 = vsub.s32 7, %v1735_v38 }
  0x13   : > { %v919_v32 = vld [vmem:[%s2171_s4 + $0x8] sm:$0xff]  ;;  %v282_v43 = vld [vmem:[%s274_s14] sm:$0xff]  ;;  %s1488_s12 = sshll.u32 %s2192_s28, 1 }
  0x14   : > { %v283_v44 = vld [vmem:[%s274_s14 + $0x8] sm:$0xff]  ;;  %v337_v50 = vrot.slane %v282_v43, %v336_v40  ;;  %v341_v51 = vrot.slane %v282_v43, %v340_v41  ;;  %v437_v57 = vrot.slane %v282_v43, %v436_v45  ;;  %v441_v58 = vrot.slane %v282_v43, %v440_v46  ;;  %s280_s15 = scalar_lea.vmem %s2174_s7, %s1488_s12 }
  0x15   : > { %1537 = vset.pattern.permute.xlu0 %v1561_v7  ;;  %v345_v52 = vrot.slane %v283_v44, %v336_v40  ;;  %v349_v53 = vrot.slane %v283_v44, %v340_v41  ;;  %v445_v59 = vrot.slane %v283_v44, %v436_v45  ;;  %v449_v60 = vrot.slane %v283_v44, %v440_v46 }
  0x16   : > { %1525 = vset.pattern.permute.xlu1 %v1558_v2  ;;  %695 = vperm.xlu0 %1537, %v291_v6   ;;  %v569_v61 = vrot.slane %v282_v43, %v568_v48  ;;  %v573_v62 = vrot.slane %v282_v43, %v572_v49  ;;  %v577_v63 = vrot.slane %v283_v44, %v568_v48 }
  0x17   : > { %563 = vperm.xlu1 %1525, %v291_v6  }
  0x1a   : > { %679 = vperm.xlu0 %1537, %v287_v4  }
  0x1b   : > { %1526 = vset.pattern.permute.xlu1 %v1560_v5 }
  0x1c   : > { %423 = vperm.xlu1 %1526, %v289_v1  }
  0x1e   : > { %1542 = vset.pattern.permute.xlu0 %v1560_v5 }
  0x1f   : > { %431 = vperm.xlu0 %1542, %v291_v6  }
  0x20   : > { %1527 = vset.pattern.permute.xlu1 %v1558_v2 }
  0x21   : > { %559 = vperm.xlu1 %1527, %v290_v0  }
  0x23   : > { %415 = vperm.xlu0 %1542, %v287_v4  }
  0x25   : > { %1528 = vset.pattern.permute.xlu1 %v1559_v3 }
  0x26   : > { %314 = vperm.xlu1 %1528, %v288_v8  }
  0x27   : > { %403 = vperm.xlu0 %1542, %v284_v9  }
  0x2a   : > { %1529 = vset.pattern.permute.xlu1 %v1560_v5 }
  0x2b   : > { %419 = vperm.xlu1 %1529, %v288_v8   ;;  %1544 = vset.pattern.permute.xlu0 %v1559_v3 }
  0x2c   : > { %329 = vperm.xlu0 %1544, %v291_v6  }
  0x2f   : > { %1531 = vset.pattern.permute.xlu1 %v1561_v7 }
  0x30   : > { %691 = vperm.xlu1 %1531, %v290_v0   ;;  %319 = vperm.xlu0 %1544, %v289_v1   ;;  %v581_v0 = vrot.slane %v283_v44, %v572_v49 }
  0x34   : > { %1532 = vset.pattern.permute.xlu1 %v1559_v3  ;;  %843 = vperm.xlu0 %1544, %v805_v10   ;;  %v713_v10 = vrot.slane %v283_v44, %v704_v56 }
  0x35   : > { %309 = vperm.xlu1 %1532, %v287_v4   ;;  %v1760_v4 = vrot.slane %v345_v52, %v336_v40 }
  0x38   : > { %299 = vperm.xlu0 %1544, %v285_v11  }
  0x39   : > { %1533 = vset.pattern.permute.xlu1 %v1558_v2 }
  0x3a   : > { %551 = vperm.xlu1 %1533, %v288_v8  }
  0x3c   : > { %828 = vperm.xlu0 %1544, %v802_v12   ;;  %v1768_v12 = vrot.slane %v441_v58, %v436_v45 }
  0x3e   : > { %1534 = vset.pattern.permute.xlu1 %v1561_v7 }
  0x3f   : > { %687 = vperm.xlu1 %1534, %v289_v1  }
  0x40   : > { %823 = vperm.xlu0 %1544, %v801_v13   ;;  %v1770_v13 = vrot.slane %v445_v59, %v436_v45 }
  0x43   : > { %1535 = vset.pattern.permute.xlu1 %v1559_v3 }
  0x44   : > { %304 = vperm.xlu1 %1535, %v286_v14   ;;  %818 = vperm.xlu0 %1544, %v800_v15   ;;  %v1774_v15 = vrot.slane %v569_v61, %v568_v48 }
  0x48   : > { %1536 = vset.pattern.permute.xlu1 %v1560_v5  ;;  %808 = vperm.xlu0 %1544, %v798_v16   ;;  %v1776_v16 = vrot.slane %v573_v62, %v568_v48 }
  0x49   : > { %411 = vperm.xlu1 %1536, %v286_v14  }
  0x4c   : > { %958 = vperm.xlu0 %1544, %v924_v17   ;;  %v1778_v17 = vrot.slane %v577_v63, %v568_v48 }
  0x4d   : > { %1538 = vset.pattern.permute.xlu1 %v1561_v7 }
  0x4e   : > { %683 = vperm.xlu1 %1538, %v288_v8   ;;  %v709_v8 = vrot.slane %v283_v44, %v700_v55 }
  0x50   : > { %948 = vperm.xlu0 %1544, %v922_v18   ;;  %v1780_v18 = vrot.slane %v581_v0, %v568_v48 }
  0x52   : > { %1539 = vset.pattern.permute.xlu1 %v1559_v3 }
  0x53   : > { %838 = vperm.xlu1 %1539, %v804_v19  }
  0x54   : > { %938 = vperm.xlu0 %1544, %v920_v20  }
  0x57   : > { %1540 = vset.pattern.permute.xlu1 %v1560_v5  ;;  %v1762_v5 = vrot.slane %v349_v53, %v336_v40 }
  0x58   : > { %407 = vperm.xlu1 %1540, %v285_v11   ;;  %928 = vperm.xlu0 %1544, %v918_v21  }
  0x5c   : > { %1541 = vset.pattern.permute.xlu1 %v1558_v2 }
  0x5d   : > { %543 = vperm.xlu1 %1541, %v286_v14  }
  0x61   : > { %1543 = vset.pattern.permute.xlu1 %v1559_v3 }
  0x62   : > { %833 = vperm.xlu1 %1543, %v803_v22  }
  0x66   : > { %294 = vperm.xlu1 %1543, %v284_v9  }
  0x6a   : > { %1545 = vset.pattern.permute.xlu1 %v1558_v2 }
  0x6b   : > { %539 = vperm.xlu1 %1545, %v285_v11  }
  0x6f   : > { %1546 = vset.pattern.permute.xlu1 %v1561_v7 }
  0x70   : > { %675 = vperm.xlu1 %1546, %v286_v14   ;;  %v1772_v14 = vrot.slane %v449_v60, %v436_v45 }
  0x74   : > { %1547 = vset.pattern.permute.xlu1 %v1558_v2  ;;  %v1756_v2 = vrot.slane %v337_v50, %v336_v40 }
  0x75   : > { %535 = vperm.xlu1 %1547, %v284_v9  }
  0x79   : > { %1548 = vset.pattern.permute.xlu1 %v1561_v7  ;;  %v701_v7 = vrot.slane %v282_v43, %v700_v55 }
  0x7a   : > { %671 = vperm.xlu1 %1548, %v285_v11   ;;  %v1766_v11 = vrot.slane %v437_v57, %v436_v45 }
  0x7e   : > { %667 = vperm.xlu1 %1548, %v284_v9   ;;  %v705_v9 = vrot.slane %v282_v43, %v704_v56 }
  0x82   : > { %1549 = vset.pattern.permute.xlu1 %v1559_v3  ;;  %v1758_v3 = vrot.slane %v341_v51, %v336_v40 }
  0x83   : > { %813 = vperm.xlu1 %1549, %v799_v23  }
  0x87   : > { %963 = vperm.xlu1 %1549, %v925_v24   ;;  %v1788_v24 = vrot.slane %v701_v7, %v700_v55 }
  0x88   : > { %v1704_v26 = vpop.permute.xlu1 %324  ;;  %v1706_v27 = vpop.permute.xlu0 %555 }
  0x8b   : > { %953 = vperm.xlu1 %1549, %v923_v28   ;;  %v1790_v28 = vrot.slane %v709_v8, %v700_v55 }
  0x8c   : > { %v1713_v29 = vpop.permute.xlu0 %547 }
  0x8d   : > { %v1718_v31 = vpop.permute.xlu1 %427 }
  0x8f   : > { %943 = vperm.xlu1 %1549, %v921_v30   ;;  %v1792_v30 = vrot.slane %v705_v9, %v700_v55 }
  0x91   : > { %v1725_v33 = vpop.permute.xlu0 %695 }
  0x92   : > { %v1727_v35 = vpop.permute.xlu1 %563  ;;  %v762_v48 = vmul.f32 %v1788_v24, %v1725_v33  ;;  %v764_v49 = vmul.f32 %v1790_v28, %v1725_v33  ;;  %v763_v52 = vmul.f32 %v1792_v30, %v1725_v33 }
  0x93   : > { %933 = vperm.xlu1 %1549, %v919_v32   ;;  %v1794_v32 = vrot.slane %v713_v10, %v700_v55  ;;  %v630_v55 = vmul.f32 %v1774_v15, %v1727_v35  ;;  %v631_v56 = vmul.f32 %v1776_v16, %v1727_v35  ;;  %v632_v57 = vmul.f32 %v1778_v17, %v1727_v35 }
  0x94   : > { %v633_v58 = vmul.f32 %v1780_v18, %v1727_v35 }
  0x95   : > { %v1733_v37 = vpop.permute.xlu0 %679  ;;  %2183 = vst [vmem:[#allocation3_spill] sm:$0xff] %v1794_v32  ;;  %v765_v53 = vmul.f32 %v1794_v32, %v1725_v33 }
  0x97   : > { %v1737_v39 = vpop.permute.xlu1 %423  ;;  %1253 = vperm.xlu1 %1549, %v1250_v36  }
  0x9a   : > { %v432_v42 = vpop.permute.xlu0 %431 }
  0x9b   : > { %v498_v19 = vmul.f32 %v1766_v11, %v432_v42  ;;  %v499_v20 = vmul.f32 %v1768_v12, %v432_v42  ;;  %v500_v21 = vmul.f32 %v1770_v13, %v432_v42  ;;  %v501_v22 = vmul.f32 %v1772_v14, %v432_v42 }
  0x9c   : > { %v1746_v47 = vpop.permute.xlu1 %559 }
  0x9e   : > { %v1750_v54 = vpop.permute.xlu0 %415 }
  0x9f   : > { %v482_v63 = vmul.f32 %v1766_v11, %v1750_v54  ;;  %v483_v33 = vmul.f32 %v1768_v12, %v1750_v54 }
  0xa1   : > { %v1754_v1 = vpop.permute.xlu1 %314 }
  0xa2   : > { %v1764_v6 = vpop.permute.xlu0 %403 }
  0xa6   : > { %v1786_v23 = vpop.permute.xlu1 %419 }
  0xa7   : > { %v330_v34 = vpop.permute.xlu0 %329 }
  0xa8   : > { %v398_v36 = vmul.f32 %v1756_v2, %v330_v34  ;;  %v399_v40 = vmul.f32 %v1758_v3, %v330_v34  ;;  %v400_v41 = vmul.f32 %v1760_v4, %v330_v34  ;;  %v401_v43 = vmul.f32 %v1762_v5, %v330_v34 }
  0xaa   : > { %v530_v42 = vadd.f32 %v498_v19, %v398_v36  ;;  %v532_v44 = vadd.f32 %v500_v21, %v400_v41  ;;  %v531_v45 = vadd.f32 %v499_v20, %v399_v40  ;;  %v533_v46 = vadd.f32 %v501_v22, %v401_v43 }
  0xab   : > { %v1804_v50 = vpop.permute.xlu1 %691  ;;  %v1806_v51 = vpop.permute.xlu0 %319  ;;  %v485_v20 = vmul.f32 %v1772_v14, %v1750_v54  ;;  %v614_v43 = vmul.f32 %v1774_v15, %v1713_v29 }
  0xac   : > { %v663_v59 = vadd.f32 %v631_v56, %v531_v45  ;;  %v665_v60 = vadd.f32 %v633_v58, %v533_v46  ;;  %v662_v61 = vadd.f32 %v630_v55, %v530_v42  ;;  %v664_v62 = vadd.f32 %v632_v57, %v532_v44 }
  0xad   : > { %v615_v42 = vmul.f32 %v1776_v16, %v1713_v29  ;;  %v484_v44 = vmul.f32 %v1770_v13, %v1750_v54  ;;  %v617_v55 = vmul.f32 %v1780_v18, %v1713_v29  ;;  %v746_v54 = vmul.f32 %v1788_v24, %v1733_v37 }
  0xae   : > { %v795_v8 = vadd.f32 %v763_v52, %v663_v59  ;;  %v797_v9 = vadd.f32 %v765_v53, %v665_v60  ;;  %v794_v10 = vadd.f32 %v762_v48, %v662_v61  ;;  %v796_v19 = vadd.f32 %v764_v49, %v664_v62 }
  0xaf   : > { %v844_v0 = vpop.permute.xlu0 %843  ;;  %v616_v59 = vmul.f32 %v1778_v17, %v1713_v29  ;;  %v747_v60 = vmul.f32 %v1792_v30, %v1733_v37  ;;  %v749_v61 = vmul.f32 %v1794_v32, %v1733_v37 }
  0xb0   : > { %v310_v7 = vpop.permute.xlu1 %309  ;;  %v875_v34 = vadd.f32 %v844_v0, %v795_v8  ;;  %v877_v36 = vadd.f32 %v844_v0, %v797_v9  ;;  %v874_v40 = vadd.f32 %v844_v0, %v794_v10  ;;  %v876_v41 = vadd.f32 %v844_v0, %v796_v19 }
  0xb1   : > { %v382_v35 = vmul.f32 %v1756_v2, %v310_v7  ;;  %v383_v21 = vmul.f32 %v1758_v3, %v310_v7  ;;  %v385_v22 = vmul.f32 %v1762_v5, %v310_v7  ;;  %v384_v45 = vmul.f32 %v1760_v4, %v310_v7 }
  0xb2   : > { %v907_v46 = vmax.f32 %v875_v34, 0.0  ;;  %v909_v48 = vmax.f32 %v877_v36, 0.0  ;;  %v906_v52 = vmax.f32 %v874_v40, 0.0  ;;  %v908_v53 = vmax.f32 %v876_v41, 0.0 }
  0xb3   : > { %v514_v56 = vadd.f32 %v482_v63, %v382_v35  ;;  %v515_v57 = vadd.f32 %v483_v33, %v383_v21  ;;  %v517_v58 = vadd.f32 %v485_v20, %v385_v22  ;;  %v516_v62 = vadd.f32 %v484_v44, %v384_v45 }
  0xb4   : > { %1007 = vmatprep.subr.mxu0 %v907_v46  ;;  %1120 = vmatprep.subr.mxu1 %v909_v48  ;;  %v748_v63 = vmul.f32 %v1790_v28, %v1733_v37  ;;  %v494_v21 = vmul.f32 %v1766_v11, %v1718_v31  ;;  %v495_v37 = vmul.f32 %v1768_v12, %v1718_v31 }
  0xb5   : > { %v1836_v49 = vpop.permute.xlu1 %551  ;;  %1008 = vmatpush1.msra.mxu0 %v906_v52  ;;  %1121 = vmatpush1.msra.mxu1 %v908_v53  ;;  %v647_v29 = vadd.f32 %v615_v42, %v515_v57  ;;  %v649_v0 = vadd.f32 %v617_v55, %v517_v58  ;;  %v646_v7 = vadd.f32 %v614_v43, %v514_v56 }
  0xb6   : > { %v648_v19 = vadd.f32 %v616_v59, %v516_v62  ;;  %v496_v22 = vmul.f32 %v1770_v13, %v1718_v31  ;;  %v497_v34 = vmul.f32 %v1772_v14, %v1718_v31  ;;  %v394_v40 = vmul.f32 %v1756_v2, %v1704_v26 }
  0xb7   : > { %v1852_v8 = vadd.f32 %v747_v60, %v647_v29  ;;  %v1854_v9 = vadd.f32 %v749_v61, %v649_v0  ;;  %v1856_v10 = vadd.f32 %v746_v54, %v646_v7  ;;  %v395_v41 = vmul.f32 %v1758_v3, %v1704_v26 }
  0xb8   : > { %v1858_v20 = vadd.f32 %v748_v63, %v648_v19  ;;  %v396_v43 = vmul.f32 %v1760_v4, %v1704_v26  ;;  %v397_v42 = vmul.f32 %v1762_v5, %v1704_v26  ;;  %v626_v44 = vmul.f32 %v1774_v15, %v1746_v47 }
  0xb9   : > { %v627_v31 = vmul.f32 %v1776_v16, %v1746_v47  ;;  %v628_v45 = vmul.f32 %v1778_v17, %v1746_v47  ;;  %v629_v46 = vmul.f32 %v1780_v18, %v1746_v47  ;;  %v526_v48 = vadd.f32 %v494_v21, %v394_v40 }
  0xba   : > { %v1850_v33 = vpop.permute.xlu1 %687  ;;  %v527_v52 = vadd.f32 %v495_v37, %v395_v41  ;;  %v528_v53 = vadd.f32 %v496_v22, %v396_v43  ;;  %v529_v55 = vadd.f32 %v497_v34, %v397_v42  ;;  %v758_v56 = vmul.f32 %v1788_v24, %v1804_v50 }
  0xbb   : > { %v759_v26 = vmul.f32 %v1792_v30, %v1804_v50  ;;  %v760_v57 = vmul.f32 %v1790_v28, %v1804_v50  ;;  %v761_v58 = vmul.f32 %v1794_v32, %v1804_v50  ;;  %v1898_v47 = vmul.f32 %v1774_v15, %v1706_v27 }
  0xbc   : > { %v658_v54 = vadd.f32 %v626_v44, %v526_v48  ;;  %v659_v60 = vadd.f32 %v627_v31, %v527_v52  ;;  %v660_v61 = vadd.f32 %v628_v45, %v528_v53  ;;  %v661_v62 = vadd.f32 %v629_v46, %v529_v55 }
  0xbd   : > { %v1902_v63 = vmul.f32 %v1776_v16, %v1706_v27  ;;  %v1906_v29 = vmul.f32 %v1778_v17, %v1706_v27  ;;  %v1910_v50 = vmul.f32 %v1780_v18, %v1706_v27  ;;  %v490_v0 = vmul.f32 %v1766_v11, %v1737_v39 }
  0xbe   : > { %v791_v7 = vadd.f32 %v759_v26, %v659_v60  ;;  %v793_v19 = vadd.f32 %v761_v58, %v661_v62  ;;  %v790_v21 = vadd.f32 %v758_v56, %v658_v54  ;;  %v792_v37 = vadd.f32 %v760_v57, %v660_v61  ;;  %v1938_v60 = vpop.permute.xlu0 %299 }
  0xbf   : > { %v1860_v35 = vpop.permute.xlu1 %304  ;;  %v386_v22 = vmul.f32 %v1756_v2, %v1754_v1  ;;  %v387_v34 = vmul.f32 %v1758_v3, %v1754_v1  ;;  %v388_v40 = vmul.f32 %v1760_v4, %v1754_v1  ;;  %v389_v27 = vmul.f32 %v1762_v5, %v1754_v1  ;;  %2184 = vst [vmem:[#allocation4_spill] sm:$0xff] %v1938_v60 }
  0xc0   : > { %v486_v45 = vmul.f32 %v1766_v11, %v1786_v23  ;;  %v487_v46 = vmul.f32 %v1768_v12, %v1786_v23  ;;  %v488_v48 = vmul.f32 %v1770_v13, %v1786_v23  ;;  %v489_v52 = vmul.f32 %v1772_v14, %v1786_v23 }
  0xc1   : > { %v390_v26 = vmul.f32 %v1756_v2, %v1806_v51  ;;  %v391_v57 = vmul.f32 %v1758_v3, %v1806_v51  ;;  %v392_v58 = vmul.f32 %v1760_v4, %v1806_v51  ;;  %v393_v54 = vmul.f32 %v1762_v5, %v1806_v51 }
  0xc2   : > { %v491_v23 = vmul.f32 %v1768_v12, %v1737_v39  ;;  %v492_v61 = vmul.f32 %v1770_v13, %v1737_v39  ;;  %v493_v62 = vmul.f32 %v1772_v14, %v1737_v39  ;;  %v618_v51 = vmul.f32 %v1774_v15, %v1836_v49 }
  0xc3   : > { %v621_v39 = vmul.f32 %v1780_v18, %v1836_v49 }
  0xc4   : > { %v1870_v36 = vpop.permute.xlu1 %411 }
  0xc9   : > { %v684_v59 = vpop.permute.xlu1 %683 }
  0xce   : > { %v839_v41 = vpop.permute.xlu1 %838 }
  0xcf   : > { %v871_v43 = vadd.f32 %v839_v41, %v791_v7  ;;  %v873_v42 = vadd.f32 %v839_v41, %v793_v19  ;;  %v870_v44 = vadd.f32 %v839_v41, %v790_v21  ;;  %v872_v31 = vadd.f32 %v839_v41, %v792_v37 }
  0xd0   : > { %v518_v19 = vadd.f32 %v486_v45, %v386_v22  ;;  %v519_v21 = vadd.f32 %v487_v46, %v387_v34  ;;  %v520_v37 = vadd.f32 %v488_v48, %v388_v40  ;;  %v521_v41 = vadd.f32 %v489_v52, %v389_v27  ;;  %v829_v48 = vpop.permute.xlu0 %828 }
  0xd1   : > { %v903_v53 = vmax.f32 %v871_v43, 0.0  ;;  %v905_v55 = vmax.f32 %v873_v42, 0.0  ;;  %v902_v1 = vmax.f32 %v870_v44, 0.0  ;;  %v904_v56 = vmax.f32 %v872_v31, 0.0 }
  0xd2   : > { %v619_v43 = vmul.f32 %v1776_v16, %v1836_v49  ;;  %v620_v42 = vmul.f32 %v1778_v17, %v1836_v49  ;;  %v522_v44 = vadd.f32 %v490_v0, %v390_v26  ;;  %v523_v31 = vadd.f32 %v491_v23, %v391_v57 }
  0xd3   : > { %v1946_v7 = vpop.permute.xlu1 %407  ;;  %1009 = vmatprep.subr.mxu0 %v903_v53  ;;  %1122 = vmatprep.subr.mxu1 %v905_v55  ;;  %v524_v22 = vadd.f32 %v492_v61, %v392_v58  ;;  %v525_v34 = vadd.f32 %v493_v62, %v393_v54  ;;  %v750_v40 = vmul.f32 %v1788_v24, %v684_v59 }
  0xd4   : > { %2185 = vst [vmem:[#allocation5_spill] sm:$0xff] %v1946_v7  ;;  %1010 = vmatpush1.msra.mxu0 %v902_v1  ;;  %1123 = vmatpush1.msra.mxu1 %v904_v56  ;;  %v751_v27 = vmul.f32 %v1792_v30, %v684_v59  ;;  %v752_v45 = vmul.f32 %v1790_v28, %v684_v59 }
  0xd5   : > { %v753_v46 = vmul.f32 %v1794_v32, %v684_v59  ;;  %v754_v52 = vmul.f32 %v1788_v24, %v1850_v33  ;;  %v755_v49 = vmul.f32 %v1792_v30, %v1850_v33  ;;  %v756_v0 = vmul.f32 %v1790_v28, %v1850_v33 }
  0xd6   : > { %v757_v53 = vmul.f32 %v1794_v32, %v1850_v33  ;;  %v650_v1 = vadd.f32 %v618_v51, %v518_v19  ;;  %v651_v56 = vadd.f32 %v619_v43, %v519_v21  ;;  %v652_v26 = vadd.f32 %v620_v42, %v520_v37  ;;  %v824_v21 = vpop.permute.xlu0 %823 }
  0xd7   : > { %v653_v57 = vadd.f32 %v621_v39, %v521_v41  ;;  %v655_v59 = vadd.f32 %v1902_v63, %v523_v31  ;;  %v657_v58 = vadd.f32 %v1910_v50, %v525_v34  ;;  %v654_v54 = vadd.f32 %v1898_v47, %v522_v44 }
  0xd8   : > { %v1968_v55 = vpop.permute.xlu1 %543  ;;  %v656_v23 = vadd.f32 %v1906_v29, %v524_v22  ;;  %v783_v61 = vadd.f32 %v751_v27, %v651_v56  ;;  %v782_v25 = vadd.f32 %v750_v40, %v650_v1  ;;  %v784_v38 = vadd.f32 %v752_v45, %v652_v26 }
  0xd9   : > { %v785_v62 = vadd.f32 %v753_v46, %v653_v57  ;;  %v787_v7 = vadd.f32 %v755_v49, %v655_v59  ;;  %v789_v33 = vadd.f32 %v757_v53, %v657_v58  ;;  %v786_v60 = vadd.f32 %v754_v52, %v654_v54 }
  0xda   : > { %v788_v32 = vadd.f32 %v756_v0, %v656_v23  ;;  %v863_v43 = vadd.f32 %v829_v48, %v783_v61  ;;  %v862_v42 = vadd.f32 %v829_v48, %v782_v25  ;;  %v864_v47 = vadd.f32 %v829_v48, %v784_v38 }
  0xdb   : > { %v865_v50 = vadd.f32 %v829_v48, %v785_v62  ;;  %v859_v34 = vadd.f32 %v824_v21, %v1852_v8  ;;  %v861_v40 = vadd.f32 %v824_v21, %v1854_v9  ;;  %v379_v25 = vmul.f32 %v1758_v3, %v1860_v35 }
  0xdc   : > { %v895_v38 = vmax.f32 %v863_v43, 0.0  ;;  %v380_v8 = vmul.f32 %v1760_v4, %v1860_v35  ;;  %v478_v9 = vmul.f32 %v1766_v11, %v1870_v36  ;;  %v896_v45 = vmax.f32 %v864_v47, 0.0  ;;  %v2186_v43 = vld [vmem:[#allocation3_spill] sm:$0xff] }
  0xdd   : > { %v834_v19 = vpop.permute.xlu1 %833  ;;  %v897_v27 = vmax.f32 %v865_v50, 0.0  ;;  %v480_v46 = vmul.f32 %v1770_v13, %v1870_v36  ;;  %v481_v48 = vmul.f32 %v1772_v14, %v1870_v36  ;;  %v891_v52 = vmax.f32 %v859_v34, 0.0 }
  0xde   : > { %v867_v37 = vadd.f32 %v834_v19, %v787_v7  ;;  %v869_v41 = vadd.f32 %v834_v19, %v789_v33  ;;  %v866_v51 = vadd.f32 %v834_v19, %v786_v60  ;;  %v868_v63 = vadd.f32 %v834_v19, %v788_v32 }
  0xdf   : > { %v858_v7 = vadd.f32 %v824_v21, %v1856_v10  ;;  %v860_v60 = vadd.f32 %v824_v21, %v1858_v20  ;;  %v378_v32 = vmul.f32 %v1756_v2, %v1860_v35  ;;  %v894_v10 = vmax.f32 %v862_v42, 0.0  ;;  %v2187_v42 = vld [vmem:[#allocation4_spill] sm:$0xff] }
  0xe0   : > { %v899_v39 = vmax.f32 %v867_v37, 0.0  ;;  %v901_v29 = vmax.f32 %v869_v41, 0.0  ;;  %v898_v44 = vmax.f32 %v866_v51, 0.0  ;;  %v900_v31 = vmax.f32 %v868_v63, 0.0 }
  0xe1   : > { %v1974_v22 = vpop.permute.xlu1 %294  ;;  %v479_v20 = vmul.f32 %v1768_v12, %v1870_v36  ;;  %v381_v49 = vmul.f32 %v1762_v5, %v1860_v35  ;;  %v893_v53 = vmax.f32 %v861_v40, 0.0  ;;  %v890_v1 = vmax.f32 %v858_v7, 0.0 }
  0xe2   : > { %1011 = vmatprep.subr.mxu0 %v899_v39  ;;  %1124 = vmatprep.subr.mxu1 %v901_v29  ;;  %v892_v56 = vmax.f32 %v860_v60, 0.0  ;;  %v610_v26 = vmul.f32 %v1774_v15, %v1968_v55  ;;  %v611_v57 = vmul.f32 %v1776_v16, %v1968_v55  ;;  %v612_v36 = vmul.f32 %v1778_v17, %v1968_v55  ;;  %v819_v60 = vpop.permute.xlu0 %818 }
  0xe3   : > { %1012 = vmatpush1.msra.mxu0 %v898_v44  ;;  %1125 = vmatpush1.msra.mxu1 %v900_v31  ;;  %v613_v59 = vmul.f32 %v1780_v18, %v1968_v55  ;;  %v510_v35 = vadd.f32 %v478_v9, %v378_v32  ;;  %v511_v58 = vadd.f32 %v479_v20, %v379_v25  ;;  %v2188_v32 = vld [vmem:[#allocation5_spill] sm:$0xff] }
  0xe4   : > { %1013 = vmatprep.subr.mxu0 %v895_v38  ;;  %1126 = vmatprep.subr.mxu1 %v897_v27  ;;  %v512_v54 = vadd.f32 %v480_v46, %v380_v8  ;;  %v513_v23 = vadd.f32 %v481_v48, %v381_v49  ;;  %v470_v61 = vmul.f32 %v1766_v11, %v1764_v6 }
  0xe5   : > { %1014 = vmatpush1.msra.mxu0 %v894_v10  ;;  %1127 = vmatpush1.msra.mxu1 %v896_v45  ;;  %v471_v62 = vmul.f32 %v1768_v12, %v1764_v6  ;;  %v642_v33 = vadd.f32 %v610_v26, %v510_v35  ;;  %v643_v19 = vadd.f32 %v611_v57, %v511_v58 }
  0xe6   : > { %v1996_v0 = vpop.permute.xlu1 %539  ;;  %1015 = vmatprep.subr.mxu0 %v891_v52  ;;  %1128 = vmatprep.subr.mxu1 %v893_v53  ;;  %v644_v21 = vadd.f32 %v612_v36, %v512_v54  ;;  %v645_v37 = vadd.f32 %v613_v59, %v513_v23  ;;  %v374_v47 = vmul.f32 %v1756_v2, %v2187_v42 }
  0xe7   : > { %1016 = vmatpush1.msra.mxu0 %v890_v1  ;;  %1129 = vmatpush1.msra.mxu1 %v892_v56  ;;  %v375_v39 = vmul.f32 %v1758_v3, %v2187_v42  ;;  %v376_v29 = vmul.f32 %v1760_v4, %v2187_v42  ;;  %v377_v44 = vmul.f32 %v1762_v5, %v2187_v42 }
  0xe8   : > { %v474_v25 = vmul.f32 %v1766_v11, %v2188_v32  ;;  %v475_v38 = vmul.f32 %v1768_v12, %v2188_v32  ;;  %v476_v27 = vmul.f32 %v1770_v13, %v2188_v32  ;;  %v477_v8 = vmul.f32 %v1772_v14, %v2188_v32 }
  0xe9   : > { %v370_v48 = vmul.f32 %v1756_v2, %v1974_v22  ;;  %v371_v11 = vmul.f32 %v1758_v3, %v1974_v22  ;;  %v372_v12 = vmul.f32 %v1760_v4, %v1974_v22  ;;  %v373_v52 = vmul.f32 %v1762_v5, %v1974_v22 }
  0xea   : > { %v472_v26 = vmul.f32 %v1770_v13, %v1764_v6  ;;  %v473_v57 = vmul.f32 %v1772_v14, %v1764_v6  ;;  %v506_v2 = vadd.f32 %v474_v25, %v374_v47  ;;  %v507_v5 = vadd.f32 %v475_v38, %v375_v39 }
  0xeb   : > { %v676_v41 = vpop.permute.xlu1 %675  ;;  %v508_v22 = vadd.f32 %v476_v27, %v376_v29  ;;  %v509_v35 = vadd.f32 %v477_v8, %v377_v44  ;;  %v502_v13 = vadd.f32 %v470_v61, %v370_v48  ;;  %v503_v54 = vadd.f32 %v471_v62, %v371_v11 }
  0xec   : > { %v742_v55 = vmul.f32 %v1788_v24, %v676_v41  ;;  %v743_v51 = vmul.f32 %v1792_v30, %v676_v41  ;;  %v744_v63 = vmul.f32 %v1790_v28, %v676_v41  ;;  %v745_v50 = vmul.f32 %v2186_v43, %v676_v41 }
  0xed   : > { %v504_v6 = vadd.f32 %v472_v26, %v372_v12  ;;  %v505_v14 = vadd.f32 %v473_v57, %v373_v52  ;;  %v606_v23 = vmul.f32 %v1774_v15, %v1996_v0  ;;  %v911_v26 = vld [vmem:[%s2170_s3 + $0x8] sm:$0xff]  ;;  %v912_v57 = vld [vmem:[%s2170_s3 + $0x10] sm:$0xff] }
  0xee   : > { %v775_v31 = vadd.f32 %v743_v51, %v643_v19  ;;  %v777_v34 = vadd.f32 %v745_v50, %v645_v37  ;;  %v774_v40 = vadd.f32 %v742_v55, %v642_v33  ;;  %v776_v7 = vadd.f32 %v744_v63, %v644_v21 }
  0xef   : > { %v607_v33 = vmul.f32 %v1776_v16, %v1996_v0  ;;  %v608_v19 = vmul.f32 %v1778_v17, %v1996_v0  ;;  %v609_v21 = vmul.f32 %v1780_v18, %v1996_v0  ;;  %v638_v0 = vadd.f32 %v606_v23, %v506_v2  ;;  %v913_v2 = vld [vmem:[%s2170_s3 + $0x18] sm:$0xff] }
  0xf0   : > { %v536_v9 = vpop.permute.xlu1 %535  ;;  %v855_v10 = vadd.f32 %v819_v60, %v775_v31  ;;  %v857_v45 = vadd.f32 %v819_v60, %v777_v34  ;;  %v854_v20 = vadd.f32 %v819_v60, %v774_v40  ;;  %v856_v46 = vadd.f32 %v819_v60, %v776_v7  ;;  %v809_v7 = vpop.permute.xlu0 %808 }
  0xf1   : > { %v602_v36 = vmul.f32 %v1774_v15, %v536_v9  ;;  %v603_v3 = vmul.f32 %v1776_v16, %v536_v9  ;;  %v604_v4 = vmul.f32 %v1778_v17, %v536_v9  ;;  %v605_v59 = vmul.f32 %v1780_v18, %v536_v9 }
  0xf2   : > { %v887_v49 = vmax.f32 %v855_v10, 0.0  ;;  %v889_v53 = vmax.f32 %v857_v45, 0.0  ;;  %v886_v1 = vmax.f32 %v854_v20, 0.0  ;;  %v888_v56 = vmax.f32 %v856_v46, 0.0 }
  0xf3   : > { %v634_v37 = vadd.f32 %v602_v36, %v502_v13  ;;  %v635_v41 = vadd.f32 %v603_v3, %v503_v54  ;;  %v636_v55 = vadd.f32 %v604_v4, %v504_v6  ;;  %v637_v51 = vadd.f32 %v605_v59, %v505_v14  ;;  %v914_v36 = vld [vmem:[%s2170_s3 + $0x20] sm:$0xff]  ;;  %v915_v3 = vld [vmem:[%s2170_s3 + $0x28] sm:$0xff]  ;;  %v916_v4 = vld [vmem:[%s2170_s3 + $0x30] sm:$0xff] }
  0xf4   : > { %1017 = vmatprep.subr.mxu0 %v887_v49  ;;  %1130 = vmatprep.subr.mxu1 %v889_v53  ;;  %v639_v47 = vadd.f32 %v607_v33, %v507_v5  ;;  %v640_v39 = vadd.f32 %v608_v19, %v508_v22  ;;  %v641_v29 = vadd.f32 %v609_v21, %v509_v35  ;;  %v917_v59 = vld [vmem:[%s2170_s3 + $0x38] sm:$0xff] }
  0xf5   : > { %v672_v58 = vpop.permute.xlu1 %671  ;;  %1018 = vmatpush1.msra.mxu0 %v886_v1  ;;  %1131 = vmatpush1.msra.mxu1 %v888_v56  ;;  %v910_v1 = vld [vmem:[%s2170_s3] sm:$0xff]  ;;  %v2189_v56 = vmov 0.0  }
  0xf6   : > { %v738_v61 = vmul.f32 %v1788_v24, %v672_v58  ;;  %v739_v62 = vmul.f32 %v1792_v30, %v672_v58  ;;  %v740_v63 = vmul.f32 %v1790_v28, %v672_v58  ;;  %v741_v15 = vmul.f32 %v2186_v43, %v672_v58 }
  0xf8   : > { %v771_v60 = vadd.f32 %v739_v62, %v639_v47  ;;  %v773_v32 = vadd.f32 %v741_v15, %v641_v29  ;;  %v770_v25 = vadd.f32 %v738_v61, %v638_v0  ;;  %v772_v38 = vadd.f32 %v740_v63, %v640_v39  ;;  %v959_v0 = vpop.permute.xlu0 %958 }
  0xf9   : > { %v668_v50 = vpop.permute.xlu1 %667 }
  0xfa   : > { %v734_v16 = vmul.f32 %v1788_v24, %v668_v50  ;;  %v735_v17 = vmul.f32 %v1792_v30, %v668_v50  ;;  %v736_v42 = vmul.f32 %v1790_v28, %v668_v50  ;;  %v737_v18 = vmul.f32 %v2186_v43, %v668_v50 }
  0xfc   : > { %v767_v44 = vadd.f32 %v735_v17, %v635_v41  ;;  %v769_v31 = vadd.f32 %v737_v18, %v637_v51  ;;  %v766_v34 = vadd.f32 %v734_v16, %v634_v37  ;;  %v768_v40 = vadd.f32 %v736_v42, %v636_v55 }
  0xfe   : > { %v814_v24 = vpop.permute.xlu1 %813  ;;  %v847_v27 = vadd.f32 %v809_v7, %v767_v44  ;;  %v849_v30 = vadd.f32 %v809_v7, %v769_v31  ;;  %v846_v10 = vadd.f32 %v809_v7, %v766_v34  ;;  %v848_v45 = vadd.f32 %v809_v7, %v768_v40  ;;  %v949_v7 = vpop.permute.xlu0 %948 }
  0xff   : > { %v851_v8 = vadd.f32 %v814_v24, %v771_v60  ;;  %v853_v28 = vadd.f32 %v814_v24, %v773_v32  ;;  %v850_v9 = vadd.f32 %v814_v24, %v770_v25  ;;  %v852_v43 = vadd.f32 %v814_v24, %v772_v38 }
 0x100   : > { %v879_v12 = vmax.f32 %v847_v27, 0.0  ;;  %v881_v52 = vmax.f32 %v849_v30, 0.0  ;;  %v878_v49 = vmax.f32 %v846_v10, 0.0  ;;  %v880_v53 = vmax.f32 %v848_v45, 0.0 }
 0x101   : > { %v883_v20 = vmax.f32 %v851_v8, 0.0  ;;  %v885_v46 = vmax.f32 %v853_v28, 0.0  ;;  %v882_v48 = vmax.f32 %v850_v9, 0.0  ;;  %v884_v11 = vmax.f32 %v852_v43, 0.0 }
 0x102   : > { %v964_v17 = vpop.permute.xlu1 %963 }
 0x103   : > { %1019 = vmatprep.subr.mxu0 %v883_v20  ;;  %1132 = vmatprep.subr.mxu1 %v885_v46 }
 0x104   : > { %1020 = vmatpush1.msra.mxu0 %v882_v48  ;;  %1133 = vmatpush1.msra.mxu1 %v884_v11 }
 0x105   : > { %1021 = vmatprep.subr.mxu0 %v879_v12  ;;  %1134 = vmatprep.subr.mxu1 %v881_v52 }
 0x106   : > { %1022 = vmatpush1.msra.mxu0 %v878_v49  ;;  %1135 = vmatpush1.msra.mxu1 %v880_v53  ;;  %v954_v31 = vpop.permute.xlu1 %953 }
 0x107   : > { %1489 = vmatmul.mubr.msk.f32.vlgmr.msra.gmra.mxu0 %vm966_vm0, %v910_v1  ;;  %1497 = vmatmul.mubr.msk.f32.vlgmr.msra.gmra.mxu1 %vm966_vm0, %v910_v1 }
 0x108   : > { %1061 = vmatprep.mubr.f32.mxu0 %v2189_v56  ;;  %1174 = vmatprep.mubr.f32.mxu1 %v2189_v56 }
 0x10a   : > { %v944_v46 = vpop.permute.xlu1 %943 }
 0x10b   : > { %1490 = vmatmul.mubr.msk.f32.gmra.mxu0 %vm966_vm0, %v911_v26  ;;  %1498 = vmatmul.mubr.msk.f32.gmra.mxu1 %vm966_vm0, %v911_v26  ;;  %v939_v26 = vpop.permute.xlu0 %938 }
 0x10c   : > { %1067 = vmatprep.mubr.f32.mxu0 %v2189_v56  ;;  %1180 = vmatprep.mubr.f32.mxu1 %v2189_v56 }
 0x10f   : > { %1491 = vmatmul.mubr.msk.f32.gmra.mxu0 %vm966_vm0, %v912_v57  ;;  %1499 = vmatmul.mubr.msk.f32.gmra.mxu1 %vm966_vm0, %v912_v57 }
 0x110   : > { %1073 = vmatprep.mubr.f32.mxu0 %v2189_v56  ;;  %1186 = vmatprep.mubr.f32.mxu1 %v2189_v56 }
 0x113   : > { %1492 = vmatmul.mubr.msk.f32.gmra.mxu0 %vm966_vm0, %v913_v2  ;;  %1500 = vmatmul.mubr.msk.f32.gmra.mxu1 %vm966_vm0, %v913_v2 }
 0x114   : > { %1079 = vmatprep.mubr.f32.mxu0 %v2189_v56  ;;  %1192 = vmatprep.mubr.f32.mxu1 %v2189_v56 }
 0x117   : > { %1493 = vmatmul.mubr.msk.f32.gmra.mxu0 %vm966_vm0, %v914_v36  ;;  %1501 = vmatmul.mubr.msk.f32.gmra.mxu1 %vm966_vm0, %v914_v36 }
 0x118   : > { %1085 = vmatprep.mubr.f32.mxu0 %v2189_v56  ;;  %1198 = vmatprep.mubr.f32.mxu1 %v2189_v56 }
 0x11b   : > { %1494 = vmatmul.mubr.msk.f32.gmra.mxu0 %vm966_vm0, %v915_v3  ;;  %1502 = vmatmul.mubr.msk.f32.gmra.mxu1 %vm966_vm0, %v915_v3 }
 0x11c   : > { %1091 = vmatprep.mubr.f32.mxu0 %v2189_v56  ;;  %1204 = vmatprep.mubr.f32.mxu1 %v2189_v56 }
 0x11f   : > { %1495 = vmatmul.mubr.msk.f32.gmra.mxu0 %vm966_vm0, %v916_v4  ;;  %1503 = vmatmul.mubr.msk.f32.gmra.mxu1 %vm966_vm0, %v916_v4 }
 0x120   : > { %1097 = vmatprep.mubr.f32.mxu0 %v2189_v56  ;;  %1210 = vmatprep.mubr.f32.mxu1 %v2189_v56 }
 0x123   : > { %1496 = vmatmul.mubr.msk.f32.gmra.mxu0 %vm966_vm0, %v917_v59  ;;  %1504 = vmatmul.mubr.msk.f32.gmra.mxu1 %vm966_vm0, %v917_v59 }
 0x124   : > { %1323 = vmatprep.mubr.f32.mxu0 %v2189_v56  ;;  %1394 = vmatprep.mubr.f32.mxu1 %v2189_v56 }
 0x1c7   : > { %v2118_v5 = vpop.f32.mrf.mxu0  ;;  %v2120_v22 = vpop.f32.mrf.mxu1 }
 0x1c9   : > { %v2122_v35 = vpop.f32.mrf.mxu0  ;;  %v2124_v58 = vpop.f32.mrf.mxu1 }
 0x1cb   : > { %v2126_v13 = vpop.f32.mrf.mxu0  ;;  %v2128_v54 = vpop.f32.mrf.mxu1 }
 0x1cd   : > { %v2130_v6 = vpop.f32.mrf.mxu0  ;;  %v2132_v14 = vpop.f32.mrf.mxu1 }
 0x1cf   : > { %v2134_v23 = vpop.f32.mrf.mxu0  ;;  %v2136_v33 = vpop.f32.mrf.mxu1 }
 0x1d1   : > { %v2138_v19 = vpop.f32.mrf.mxu0  ;;  %v2140_v21 = vpop.f32.mrf.mxu1 }
 0x1d3   : > { %v1075_v37 = vpop.f32.mrf.mxu0  ;;  %v1188_v41 = vpop.f32.mrf.mxu1 }
 0x1d5   : > { %v1077_v55 = vpop.f32.mrf.mxu0  ;;  %v1190_v51 = vpop.f32.mrf.mxu1 }
 0x1d6   : > { %v1078_v4 = vadd.f32 %v1077_v55, %v944_v46  ;;  %v1191_v59 = vadd.f32 %v1190_v51, %v944_v46  ;;  %v934_v55 = vpop.permute.xlu1 %933  ;;  %v1070_v51 = vadd.f32 %v2134_v23, %v939_v26 }
 0x1d7   : > { %v1081_v61 = vpop.f32.mrf.mxu0  ;;  %v1194_v62 = vpop.f32.mrf.mxu1 }
 0x1d8   : > { %v1082_v57 = vadd.f32 %v1081_v61, %v949_v7  ;;  %v1195_v2 = vadd.f32 %v1194_v62, %v949_v7  ;;  %v1185_v61 = vadd.f32 %v2140_v21, %v939_v26  ;;  %v929_v21 = vpop.permute.xlu0 %928 }
 0x1d9   : > { %v1083_v63 = vpop.f32.mrf.mxu0  ;;  %v1196_v15 = vpop.f32.mrf.mxu1 }
 0x1da   : > { %v1084_v49 = vadd.f32 %v1083_v63, %v949_v7  ;;  %v1197_v53 = vadd.f32 %v1196_v15, %v949_v7  ;;  %v1189_v63 = vadd.f32 %v1188_v41, %v944_v46  ;;  %v1066_v41 = vadd.f32 %v2130_v6, %v934_v55 }
 0x1db   : > { %v1087_v50 = vpop.f32.mrf.mxu0  ;;  %v1200_v16 = vpop.f32.mrf.mxu1  ;;  %v1173_v7 = vadd.f32 %v2124_v58, %v929_v21 }
 0x1dc   : > { %v1088_v48 = vadd.f32 %v1087_v50, %v954_v31  ;;  %v1201_v11 = vadd.f32 %v1200_v16, %v954_v31  ;;  %v1076_v16 = vadd.f32 %v1075_v37, %v944_v46  ;;  %v1234_v62 = vmax.f32 %v1084_v49, 0.0  ;;  %v2190_v46 = vld [vmem:[#allocation2_spill] sm:$0xff] }
 0x1dd   : > { %v1089_v42 = vpop.f32.mrf.mxu0  ;;  %v1202_v18 = vpop.f32.mrf.mxu1  ;;  %v1235_v37 = vmax.f32 %v1195_v2, 0.0 }
 0x1de   : > { %v1090_v43 = vadd.f32 %v1089_v42, %v954_v31  ;;  %v1203_v10 = vadd.f32 %v1202_v18, %v954_v31  ;;  %v1237_v15 = vmax.f32 %v1088_v48, 0.0  ;;  %v1239_v42 = vmax.f32 %v1201_v11, 0.0 }
 0x1df   : > { %v1093_v47 = vpop.f32.mrf.mxu0  ;;  %v1206_v39 = vpop.f32.mrf.mxu1  ;;  %v1072_v18 = vadd.f32 %v2138_v19, %v939_v26  ;;  %v1230_v19 = vmax.f32 %v1078_v4, 0.0  ;;  %v1064_v31 = vadd.f32 %v2126_v13, %v934_v55  ;;  %v1229_v23 = vmax.f32 %v1076_v16, 0.0 }
 0x1e0   : > { %v1094_v28 = vadd.f32 %v1093_v47, %v959_v0  ;;  %v1207_v9 = vadd.f32 %v1206_v39, %v959_v0  ;;  %v1240_v50 = vmax.f32 %v1203_v10, 0.0  ;;  %v1183_v47 = vadd.f32 %v2136_v33, %v939_v26 }
 0x1e1   : > { %v1095_v29 = vpop.f32.mrf.mxu0  ;;  %v1208_v44 = vpop.f32.mrf.mxu1  ;;  %v1233_v39 = vmax.f32 %v1082_v57, 0.0  ;;  %v1060_v33 = vadd.f32 %v2122_v35, %v929_v21  ;;  %v1226_v6 = vmax.f32 %v1072_v18, 0.0 }
 0x1e2   : > { %v1096_v24 = vadd.f32 %v1095_v29, %v959_v0  ;;  %v1209_v27 = vadd.f32 %v1208_v44, %v959_v0  ;;  %v1241_v36 = vmax.f32 %v1094_v28, 0.0  ;;  %v1243_v3 = vmax.f32 %v1207_v9, 0.0 }
 0x1e3   : > { %v1099_v34 = vpop.f32.mrf.mxu0  ;;  %v1212_v40 = vpop.f32.mrf.mxu1  ;;  %v1236_v0 = vmax.f32 %v1197_v53, 0.0  ;;  %v1179_v29 = vadd.f32 %v2132_v14, %v934_v55  ;;  %v1232_v44 = vmax.f32 %v1191_v59, 0.0  ;;  %v1058_v14 = vadd.f32 %v2118_v5, %v929_v21 }
 0x1e4   : > { %v1100_v60 = vadd.f32 %v1099_v34, %v964_v17  ;;  %v1213_v32 = vadd.f32 %v1212_v40, %v964_v17  ;;  %v1242_v1 = vmax.f32 %v1096_v24, 0.0  ;;  %v1244_v56 = vmax.f32 %v1209_v27, 0.0 }
 0x1e5   : > { %v1101_v25 = vpop.f32.mrf.mxu0  ;;  %v1214_v38 = vpop.f32.mrf.mxu1  ;;  %v1177_v34 = vadd.f32 %v2128_v54, %v934_v55  ;;  %v1231_v40 = vmax.f32 %v1189_v63, 0.0  ;;  %v1227_v13 = vmax.f32 %v1183_v47, 0.0  ;;  %v1222_v54 = vmax.f32 %v1066_v41, 0.0 }
 0x1e6   : > { %v1102_v30 = vadd.f32 %v1101_v25, %v964_v17  ;;  %v1215_v8 = vadd.f32 %v1214_v38, %v964_v17  ;;  %v1245_v12 = vmax.f32 %v1100_v60, 0.0  ;;  %v1247_v52 = vmax.f32 %v1213_v32, 0.0 }
 0x1e7   : > { %v1238_v17 = vmax.f32 %v1090_v43, 0.0  ;;  %v1228_v60 = vmax.f32 %v1185_v61, 0.0  ;;  %v1171_v32 = vadd.f32 %v2120_v22, %v929_v21  ;;  %v1225_v25 = vmax.f32 %v1070_v51, 0.0  ;;  %v1249_v22 = vld [vmem:[%s2172_s5] sm:$0x3] }
 0x1e8   : > { %v1246_v45 = vmax.f32 %v1102_v30, 0.0  ;;  %v1248_v20 = vmax.f32 %v1215_v8, 0.0  ;;  %v1224_v38 = vmax.f32 %v1179_v29, 0.0  ;;  %v1221_v24 = vmax.f32 %v1064_v31, 0.0 }
 0x1e9   : > { %v1223_v35 = vmax.f32 %v1177_v34, 0.0  ;;  %v1218_v58 = vmax.f32 %v1060_v33, 0.0  ;;  %v1220_v27 = vmax.f32 %v1173_v7, 0.0  ;;  %v1217_v30 = vmax.f32 %v1058_v14, 0.0 }
 0x1ea   : > { %1275 = vmatprep.subr.mxu0 %v1246_v45  ;;  %1346 = vmatprep.subr.mxu1 %v1248_v20  ;;  %v1219_v5 = vmax.f32 %v1171_v32, 0.0  ;;  %v1563_v8 = vmov 1983009808   ;;  %v1254_v45 = vpop.permute.xlu1 %1253 }
 0x1eb   : > { %1276 = vmatpush1.msra.mxu0 %v1245_v12  ;;  %1347 = vmatpush1.msra.mxu1 %v1247_v52  ;;  %v1408_v28 = vunpack.c.l.s4 %v1563_v8 }
 0x1ec   : > { %1277 = vmatprep.subr.mxu0 %v1242_v1  ;;  %1348 = vmatprep.subr.mxu1 %v1244_v56 }
 0x1ed   : > { %1278 = vmatpush1.msra.mxu0 %v1241_v36  ;;  %1349 = vmatpush1.msra.mxu1 %v1243_v3  ;;  %v1409_v9 = vunpack.c.0.s8 %v1408_v28 }
 0x1ee   : > { %1279 = vmatprep.subr.mxu0 %v1238_v17  ;;  %1350 = vmatprep.subr.mxu1 %v1240_v50 }
 0x1ef   : > { %1280 = vmatpush1.msra.mxu0 %v1237_v15  ;;  %1351 = vmatpush1.msra.mxu1 %v1239_v42  ;;  %v1412_v48 = vsub.s32 %v1409_v9, %v2190_v46 }
 0x1f0   : > { %1281 = vmatprep.subr.mxu0 %v1234_v62  ;;  %1352 = vmatprep.subr.mxu1 %v1236_v0 }
 0x1f1   : > { %1282 = vmatpush1.msra.mxu0 %v1233_v39  ;;  %1353 = vmatpush1.msra.mxu1 %v1235_v37 }
 0x1f2   : > { %1283 = vmatprep.subr.mxu0 %v1230_v19  ;;  %1354 = vmatprep.subr.mxu1 %v1232_v44 }
 0x1f3   : > { %1284 = vmatpush1.msra.mxu0 %v1229_v23  ;;  %1355 = vmatpush1.msra.mxu1 %v1231_v40 }
 0x1f4   : > { %1285 = vmatprep.subr.mxu0 %v1226_v6  ;;  %1356 = vmatprep.subr.mxu1 %v1228_v60 }
 0x1f5   : > { %1286 = vmatpush1.msra.mxu0 %v1225_v25  ;;  %1357 = vmatpush1.msra.mxu1 %v1227_v13 }
 0x1f6   : > { %1287 = vmatprep.subr.mxu0 %v1222_v54  ;;  %1358 = vmatprep.subr.mxu1 %v1224_v38 }
 0x1f7   : > { %1288 = vmatpush1.msra.mxu0 %v1221_v24  ;;  %1359 = vmatpush1.msra.mxu1 %v1223_v35 }
 0x1f8   : > { %1289 = vmatprep.subr.mxu0 %v1218_v58  ;;  %1360 = vmatprep.subr.mxu1 %v1220_v27 }
 0x1f9   : > { %1290 = vmatpush1.msra.mxu0 %v1217_v30  ;;  %1361 = vmatpush1.msra.mxu1 %v1219_v5 }
 0x1fa   : > { %1505 = vmatmul.mubr.msk.f32.vlgmr.msra.gmra.mxu0 %vm966_vm0, %v1249_v22  ;;  %1506 = vmatmul.mubr.msk.f32.vlgmr.msra.gmra.mxu1 %vm966_vm0, %v1249_v22 }
 0x2ba   : > { %v1325_v43 = vpop.f32.mrf.mxu0  ;;  %v1396_v10 = vpop.f32.mrf.mxu1 }
 0x2bb   : > { %v1326_v12 = vadd.f32 %v1325_v43, %v1254_v45  ;;  %v1397_v52 = vadd.f32 %v1396_v10, %v1254_v45 }
 0x2bc   : > { %v1327_v20 = vpop.f32.mrf.mxu0  ;;  %v1398_v11 = vpop.f32.mrf.mxu1 }
 0x2bd   : > { %v1328_v49 = vadd.f32 %v1327_v20, %v1254_v45  ;;  %v1399_v53 = vadd.f32 %v1398_v11, %v1254_v45 }
 0x2bf   : > { %v1405_v1 = vcombine.low %v1326_v12, %v1328_v49  ;;  %v1406_v56 = vcombine.low %v1397_v52, %v1399_v53 }
 0x2c1   : > { %v1413_v26 = vrot.slane %v1405_v1, %v1412_v48  ;;  %v1420_v57 = vrot.slane %v1406_v56, %v1412_v48 }
 0x2c3   : > { %v1421_v2 = vcombine.low %v1413_v26, %v1420_v57 }
 0x2c5   : > { %1423 = vst [vmem:[%s280_s15] sm:$0xff] %v1421_v2 }
 0x2c6 PF: > { %s17_s24 = sadd.s32 1, %s1556_s24  }
 0x2c7   : > { %p14_p4 = scmp.ge.s32.totalorder %s17_s24, 4  }
 0x2c9   :  { %16 = sbr.rel (!%p14_p4) target bundleno = 1 (0x1), region = 78 }

</bundles_post_ra>
